<compile_context>
chip_gen: v7x
topology: tpu7x:2x2x1
jax: 0.10.0
libtpu: 0.0.40
codegen_flags: <defaults>
</compile_context>

<pallas_src>
import jax
import jax.numpy as jnp
from jax.experimental import pallas as pl
from jax.experimental.pallas import tpu as pltpu

HIDDEN = 64


def _make_kernel(piece_widths):
    """Build the kernel for a fixed list of state/action piece widths."""
    n = len(piece_widths)
    offs = [0]
    for w in piece_widths:
        offs.append(offs[-1] + w)

    def kernel(*refs):
        piece_refs = refs[:n]
        h_ref, w1_ref, b123_ref, w23_ref, w4_ref, b4_ref = refs[n:n + 6]
        hout_ref, out_ref = refs[n + 6:]

        w1 = w1_ref[...]                 # (in_sz, 64), VMEM-resident
        b1 = b123_ref[0:1, :]            # (1, 64)
        b2 = b123_ref[1:2, :]
        b3 = b123_ref[2:3, :]

        # x = relu(i2i(concat(pieces)))  ==  relu(sum_i piece_i @ W1[rows_i] + b1)
        z = jnp.dot(piece_refs[0][...], w1[offs[0]:offs[1], :],
                    preferred_element_type=jnp.float32)
        for i in range(1, n):
            z = z + jnp.dot(piece_refs[i][...], w1[offs[i]:offs[i + 1], :],
                            preferred_element_type=jnp.float32)
        z1 = jnp.maximum(z + b1, 0.0)    # (TB, 64)

        # Fused i2h / h2h: [z1 | h] @ blockdiag(W2, W3) -> one 128x128 MXU pass.
        x2 = jnp.concatenate([z1, h_ref[...]], axis=-1)                 # (TB, 128)
        y = jnp.dot(x2, w23_ref[...], preferred_element_type=jnp.float32)
        inp = jnp.maximum(y[:, :HIDDEN] + b2, 0.0)
        hh = jnp.maximum(y[:, HIDDEN:] + b3, 0.0)
        hs = jax.nn.sigmoid(inp + hh)                                   # (TB, 64)
        hout_ref[...] = hs

        # h2o (N=1): VPU multiply + XLU lane reduction instead of an MXU matmul.
        out_ref[...] = (jnp.sum(hs * w4_ref[...], axis=-1, keepdims=True)
                        + b4_ref[0, 0])

    return kernel


@jax.jit
def rcritic_forward(state_list, action_list, hidden_state, c, kparams):
    """kparams = (w1, b123, w23, w4_row, b4) -- see pack_params()."""
    pieces = tuple(state_list) + tuple(action_list)
    piece_widths = tuple(int(p.shape[1]) for p in pieces)
    B = pieces[0].shape[0]
    in_sz = sum(piece_widths)
    w1, b123, w23, w4_row, b4 = kparams

    # Batch tile: whole batch if small (block == full dim is always legal),
    # otherwise 256-row tiles (multiple of 8) pipelined over a parallel grid.
    TB = B if B <= 256 else 256
    grid = (pl.cdiv(B, TB),)

    resident = lambda shape: pl.BlockSpec(shape, lambda b: (0, 0))     # weights stay in VMEM
    batch_tile = lambda width: pl.BlockSpec((TB, width), lambda b: (b, 0))

    in_specs = ([batch_tile(w) for w in piece_widths]                  # state/action pieces
                + [batch_tile(HIDDEN),                                 # hidden_state
                   resident((in_sz, HIDDEN)),                          # W1
                   resident((3, HIDDEN)),                              # [b1; b2; b3]
                   resident((2 * HIDDEN, 2 * HIDDEN)),                 # blockdiag(W2, W3)
                   resident((1, HIDDEN)),                              # W4 as a row
                   pl.BlockSpec(memory_space=pltpu.MemorySpace.SMEM)]) # b4 scalar

    h_new, out = pl.pallas_call(
        _make_kernel(piece_widths),
        out_shape=(jax.ShapeDtypeStruct((B, HIDDEN), jnp.float32),     # wide store first
                   jax.ShapeDtypeStruct((B, 1), jnp.float32)),
        grid=grid,
        in_specs=in_specs,
        out_specs=(batch_tile(HIDDEN), batch_tile(1)),
        compiler_params=pltpu.CompilerParams(dimension_semantics=("parallel",)),
    )(*pieces, hidden_state, w1, b123, w23, w4_row, b4)

    # c is returned untouched, matching the PyTorch module.
    return out, h_new, c


def init_params(key, input_size):
    """nn.Linear-style init; weights stored as (in_features, out_features)."""
    ks = jax.random.split(key, 8)

    def lin(kw, kb, fan_in, fan_out):
        bound = 1.0 / jnp.sqrt(fan_in)
        w = jax.random.uniform(kw, (fan_in, fan_out), jnp.float32, -bound, bound)
        b = jax.random.uniform(kb, (1, fan_out), jnp.float32, -bound, bound)
        return w, b

    w1, b1 = lin(ks[0], ks[1], input_size, HIDDEN)   # i2i
    w2, b2 = lin(ks[2], ks[3], HIDDEN, HIDDEN)       # i2h
    w3, b3 = lin(ks[4], ks[5], HIDDEN, HIDDEN)       # h2h
    w4, b4 = lin(ks[6], ks[7], HIDDEN, 1)            # h2o
    return (w1, b1, w2, b2, w3, b3, w4, b4)


def pack_params(w1, b1, w2, b2, w3, b3, w4, b4):
    """One-time host-side repack into the kernel layout (done outside the hot path)."""
    b123 = jnp.concatenate([b1, b2, b3], axis=0)                       # (3, 64)
    w23 = jnp.zeros((2 * HIDDEN, 2 * HIDDEN), jnp.float32)
    w23 = w23.at[:HIDDEN, :HIDDEN].set(w2).at[HIDDEN:, HIDDEN:].set(w3)  # block-diag
    w4_row = w4.reshape(1, HIDDEN)                                     # (1, 64)
    b4s = b4.reshape(1, 1)
    return (w1, b123, w23, w4_row, b4s)


if __name__ == "__main__":
    key = jax.random.PRNGKey(0)
    k_params, k_s0, k_s1, k_a0, k_a1, k_h = jax.random.split(key, 6)

    # Two agents: obs_shape = [12, 12], action_shape = [4, 4] -> input_size = 32
    B = 8
    obs_shapes = [12, 12]
    act_shapes = [4, 4]
    input_size = sum(obs_shapes) + sum(act_shapes)

    state = [
        jax.random.normal(k_s0, (B, obs_shapes[0]), jnp.float32),
        jax.random.normal(k_s1, (B, obs_shapes[1]), jnp.float32),
    ]
    action = [
        jax.random.normal(k_a0, (B, act_shapes[0]), jnp.float32),
        jax.random.normal(k_a1, (B, act_shapes[1]), jnp.float32),
    ]
    hidden_state = jax.random.normal(k_h, (B, HIDDEN), jnp.float32)
    c = jnp.zeros((B, HIDDEN), jnp.float32)

    params = init_params(k_params, input_size)
    kparams = pack_params(*params)

    out, h_new, c_out = rcritic_forward(state, action, hidden_state, c, kparams)
    jax.block_until_ready((out, h_new, c_out))

    # Pure-JAX reference check.
    w1, b1, w2, b2, w3, b3, w4, b4 = params
    x = jnp.concatenate(state + action, axis=1)
    z1 = jax.nn.relu(x @ w1 + b1)
    inp = jax.nn.relu(z1 @ w2 + b2)
    hh = jax.nn.relu(hidden_state @ w3 + b3)
    hs = jax.nn.sigmoid(inp + hh)
    out_ref = hs @ w4 + b4
    assert jnp.allclose(out, out_ref, atol=1e-4, rtol=1e-4), "output mismatch"
    assert jnp.allclose(h_new, hs, atol=1e-4, rtol=1e-4), "hidden_state mismatch"
    assert jnp.allclose(c_out, c), "c mismatch"

    print("KERNEL_OK")
</pallas_src>

<mosaic_0001>
module attributes {stable_mosaic.version = 11 : i64} {
  func.func @kernel(%arg0: i32, %arg1: memref<8x12xf32, #tpu.memory_space<vmem>>, %arg2: memref<8x12xf32, #tpu.memory_space<vmem>>, %arg3: memref<8x4xf32, #tpu.memory_space<vmem>>, %arg4: memref<8x4xf32, #tpu.memory_space<vmem>>, %arg5: memref<8x64xf32, #tpu.memory_space<vmem>>, %arg6: memref<32x64xf32, #tpu.memory_space<vmem>>, %arg7: memref<3x64xf32, #tpu.memory_space<vmem>>, %arg8: memref<128x128xf32, #tpu.memory_space<vmem>>, %arg9: memref<1x64xf32, #tpu.memory_space<vmem>>, %arg10: memref<1x1xf32, #tpu.memory_space<smem>>, %arg11: memref<8x64xf32, #tpu.memory_space<vmem>>, %arg12: memref<8x1xf32, #tpu.memory_space<vmem>>) attributes {dimension_semantics = [#tpu.dimension_semantics<parallel>], iteration_bounds = array<i64: 1>, scalar_prefetch = 0 : i64, scratch_operands = 0 : i64, tpu.core_type = #tpu.core_type<tc>, window_params = [{transform_indices = @transform_0, window_bounds = array<i64: 8, 12>}, {transform_indices = @transform_1, window_bounds = array<i64: 8, 12>}, {transform_indices = @transform_2, window_bounds = array<i64: 8, 4>}, {transform_indices = @transform_3, window_bounds = array<i64: 8, 4>}, {transform_indices = @transform_4, window_bounds = array<i64: 8, 64>}, {pipeline_mode = #tpu.pipeline_mode<synchronous>, transform_indices = @transform_5, window_bounds = array<i64: 32, 64>}, {pipeline_mode = #tpu.pipeline_mode<synchronous>, transform_indices = @transform_6, window_bounds = array<i64: 3, 64>}, {pipeline_mode = #tpu.pipeline_mode<synchronous>, transform_indices = @transform_7, window_bounds = array<i64: 128, 128>}, {pipeline_mode = #tpu.pipeline_mode<synchronous>, transform_indices = @transform_8, window_bounds = array<i64: 1, 64>}, {transform_indices = @transform_9, window_bounds = array<i64: 1, 1>}, {transform_indices = @transform_10, window_bounds = array<i64: 8, 64>}, {transform_indices = @transform_11, window_bounds = array<i64: 8, 1>}]} {
    %c0 = arith.constant 0 : index
    %c0_0 = arith.constant 0 : index
    %0 = vector.load %arg6[%c0, %c0_0] : memref<32x64xf32, #tpu.memory_space<vmem>>, vector<32x64xf32>
    %c0_1 = arith.constant 0 : index
    %c0_2 = arith.constant 0 : index
    %1 = vector.load %arg7[%c0_1, %c0_2] : memref<3x64xf32, #tpu.memory_space<vmem>>, vector<1x64xf32>
    %c1 = arith.constant 1 : index
    %c0_3 = arith.constant 0 : index
    %2 = vector.load %arg7[%c1, %c0_3] : memref<3x64xf32, #tpu.memory_space<vmem>>, vector<1x64xf32>
    %c2 = arith.constant 2 : index
    %c0_4 = arith.constant 0 : index
    %3 = vector.load %arg7[%c2, %c0_4] : memref<3x64xf32, #tpu.memory_space<vmem>>, vector<1x64xf32>
    %c0_5 = arith.constant 0 : index
    %c0_6 = arith.constant 0 : index
    %4 = vector.load %arg1[%c0_5, %c0_6] : memref<8x12xf32, #tpu.memory_space<vmem>>, vector<8x12xf32>
    %5 = vector.extract_strided_slice %0 {offsets = [0, 0], sizes = [12, 64], strides = [1, 1]} : vector<32x64xf32> to vector<12x64xf32>
    %cst = arith.constant dense<0.000000e+00> : vector<8x64xf32>
    %6 = tpu.matmul %4, %5, %cst {dimension_numbers = #tpu.dot_dimension_numbers<[1], [0], [0], [1], [0, 0, 1, 1], [], []>} : vector<8x12xf32>, vector<12x64xf32>, vector<8x64xf32> -> vector<8x64xf32>
    %c0_7 = arith.constant 0 : index
    %c0_8 = arith.constant 0 : index
    %7 = vector.load %arg2[%c0_7, %c0_8] : memref<8x12xf32, #tpu.memory_space<vmem>>, vector<8x12xf32>
    %8 = vector.extract_strided_slice %0 {offsets = [12, 0], sizes = [12, 64], strides = [1, 1]} : vector<32x64xf32> to vector<12x64xf32>
    %cst_9 = arith.constant dense<0.000000e+00> : vector<8x64xf32>
    %9 = tpu.matmul %7, %8, %cst_9 {dimension_numbers = #tpu.dot_dimension_numbers<[1], [0], [0], [1], [0, 0, 1, 1], [], []>} : vector<8x12xf32>, vector<12x64xf32>, vector<8x64xf32> -> vector<8x64xf32>
    %10 = arith.addf %6, %9 : vector<8x64xf32>
    %c0_10 = arith.constant 0 : index
    %c0_11 = arith.constant 0 : index
    %11 = vector.load %arg3[%c0_10, %c0_11] : memref<8x4xf32, #tpu.memory_space<vmem>>, vector<8x4xf32>
    %12 = vector.extract_strided_slice %0 {offsets = [24, 0], sizes = [4, 64], strides = [1, 1]} : vector<32x64xf32> to vector<4x64xf32>
    %cst_12 = arith.constant dense<0.000000e+00> : vector<8x64xf32>
    %13 = tpu.matmul %11, %12, %cst_12 {dimension_numbers = #tpu.dot_dimension_numbers<[1], [0], [0], [1], [0, 0, 1, 1], [], []>} : vector<8x4xf32>, vector<4x64xf32>, vector<8x64xf32> -> vector<8x64xf32>
    %14 = arith.addf %10, %13 : vector<8x64xf32>
    %c0_13 = arith.constant 0 : index
    %c0_14 = arith.constant 0 : index
    %15 = vector.load %arg4[%c0_13, %c0_14] : memref<8x4xf32, #tpu.memory_space<vmem>>, vector<8x4xf32>
    %16 = vector.extract_strided_slice %0 {offsets = [28, 0], sizes = [4, 64], strides = [1, 1]} : vector<32x64xf32> to vector<4x64xf32>
    %cst_15 = arith.constant dense<0.000000e+00> : vector<8x64xf32>
    %17 = tpu.matmul %15, %16, %cst_15 {dimension_numbers = #tpu.dot_dimension_numbers<[1], [0], [0], [1], [0, 0, 1, 1], [], []>} : vector<8x4xf32>, vector<4x64xf32>, vector<8x64xf32> -> vector<8x64xf32>
    %18 = arith.addf %14, %17 : vector<8x64xf32>
    %19 = vector.broadcast %1 : vector<1x64xf32> to vector<8x64xf32>
    %20 = arith.addf %18, %19 : vector<8x64xf32>
    %cst_16 = arith.constant 0.000000e+00 : f32
    %21 = vector.broadcast %cst_16 : f32 to vector<8x64xf32>
    %22 = arith.maximumf %20, %21 : vector<8x64xf32>
    %c0_17 = arith.constant 0 : index
    %c0_18 = arith.constant 0 : index
    %23 = vector.load %arg5[%c0_17, %c0_18] : memref<8x64xf32, #tpu.memory_space<vmem>>, vector<8x64xf32>
    %24 = tpu.concatenate %22, %23 in 1 : vector<8x64xf32>, vector<8x64xf32> -> vector<8x128xf32>
    %c0_19 = arith.constant 0 : index
    %c0_20 = arith.constant 0 : index
    %25 = vector.load %arg8[%c0_19, %c0_20] : memref<128x128xf32, #tpu.memory_space<vmem>>, vector<128x128xf32>
    %cst_21 = arith.constant dense<0.000000e+00> : vector<8x128xf32>
    %26 = tpu.matmul %24, %25, %cst_21 {dimension_numbers = #tpu.dot_dimension_numbers<[1], [0], [0], [1], [0, 0, 1, 1], [], []>} : vector<8x128xf32>, vector<128x128xf32>, vector<8x128xf32> -> vector<8x128xf32>
    %27 = vector.extract_strided_slice %26 {offsets = [0, 0], sizes = [8, 64], strides = [1, 1]} : vector<8x128xf32> to vector<8x64xf32>
    %28 = vector.broadcast %2 : vector<1x64xf32> to vector<8x64xf32>
    %29 = arith.addf %27, %28 : vector<8x64xf32>
    %cst_22 = arith.constant 0.000000e+00 : f32
    %30 = vector.broadcast %cst_22 : f32 to vector<8x64xf32>
    %31 = arith.maximumf %29, %30 : vector<8x64xf32>
    %32 = vector.extract_strided_slice %26 {offsets = [0, 64], sizes = [8, 64], strides = [1, 1]} : vector<8x128xf32> to vector<8x64xf32>
    %33 = vector.broadcast %3 : vector<1x64xf32> to vector<8x64xf32>
    %34 = arith.addf %32, %33 : vector<8x64xf32>
    %cst_23 = arith.constant 0.000000e+00 : f32
    %35 = vector.broadcast %cst_23 : f32 to vector<8x64xf32>
    %36 = arith.maximumf %34, %35 : vector<8x64xf32>
    %37 = arith.addf %31, %36 : vector<8x64xf32>
    %38 = arith.negf %37 : vector<8x64xf32>
    %39 = math.exp %38 : vector<8x64xf32>
    %cst_24 = arith.constant 1.000000e+00 : f32
    %40 = vector.broadcast %cst_24 : f32 to vector<8x64xf32>
    %41 = arith.addf %40, %39 : vector<8x64xf32>
    %42 = arith.divf %40, %41 : vector<8x64xf32>
    %c0_25 = arith.constant 0 : index
    %c0_26 = arith.constant 0 : index
    %43 = vector.load %arg11[%c0_25, %c0_26] : memref<8x64xf32, #tpu.memory_space<vmem>>, vector<8x64xf32>
    tpu.vector_store %arg11[%c0_25, %c0_26], %42 {strides = array<i32>} : memref<8x64xf32, #tpu.memory_space<vmem>>, vector<8x64xf32>,
    %c0_27 = arith.constant 0 : index
    %c0_28 = arith.constant 0 : index
    %44 = vector.load %arg9[%c0_27, %c0_28] : memref<1x64xf32, #tpu.memory_space<vmem>>, vector<1x64xf32>
    %45 = vector.broadcast %44 : vector<1x64xf32> to vector<8x64xf32>
    %46 = arith.mulf %42, %45 : vector<8x64xf32>
    %cst_29 = arith.constant dense<0.000000e+00> : vector<8xf32>
    %47 = vector.multi_reduction <add>, %46, %cst_29 [1] : vector<8x64xf32> to vector<8xf32>
    %48 = vector.shape_cast %47 : vector<8xf32> to vector<8x1xf32>
    %c0_30 = arith.constant 0 : index
    %c0_31 = arith.constant 0 : index
    %49 = memref.load %arg10[%c0_30, %c0_31] : memref<1x1xf32, #tpu.memory_space<smem>>
    %50 = vector.broadcast %49 : f32 to vector<8x1xf32>
    %51 = arith.addf %48, %50 : vector<8x1xf32>
    %c0_32 = arith.constant 0 : index
    %c0_33 = arith.constant 0 : index
    %52 = vector.load %arg12[%c0_32, %c0_33] : memref<8x1xf32, #tpu.memory_space<vmem>>, vector<8x1xf32>
    tpu.vector_store %arg12[%c0_32, %c0_33], %51 {strides = array<i32>} : memref<8x1xf32, #tpu.memory_space<vmem>>, vector<8x1xf32>,
    return
  }
  func.func @transform_0(%arg0: i32) -> (i32, i32) {
    %c0_i32 = arith.constant 0 : i32
    %c0_i32_0 = arith.constant 0 : i32
    return %arg0, %c0_i32 : i32, i32
  }
  func.func @transform_1(%arg0: i32) -> (i32, i32) {
    %c0_i32 = arith.constant 0 : i32
    %c0_i32_0 = arith.constant 0 : i32
    return %arg0, %c0_i32 : i32, i32
  }
  func.func @transform_2(%arg0: i32) -> (i32, i32) {
    %c0_i32 = arith.constant 0 : i32
    %c0_i32_0 = arith.constant 0 : i32
    return %arg0, %c0_i32 : i32, i32
  }
  func.func @transform_3(%arg0: i32) -> (i32, i32) {
    %c0_i32 = arith.constant 0 : i32
    %c0_i32_0 = arith.constant 0 : i32
    return %arg0, %c0_i32 : i32, i32
  }
  func.func @transform_4(%arg0: i32) -> (i32, i32) {
    %c0_i32 = arith.constant 0 : i32
    %c0_i32_0 = arith.constant 0 : i32
    return %arg0, %c0_i32 : i32, i32
  }
  func.func @transform_5(%arg0: i32) -> (i32, i32) {
    %c0_i32 = arith.constant 0 : i32
    %c0_i32_0 = arith.constant 0 : i32
    %c0_i32_1 = arith.constant 0 : i32
    return %c0_i32, %c0_i32_0 : i32, i32
  }
  func.func @transform_6(%arg0: i32) -> (i32, i32) {
    %c0_i32 = arith.constant 0 : i32
    %c0_i32_0 = arith.constant 0 : i32
    %c0_i32_1 = arith.constant 0 : i32
    return %c0_i32, %c0_i32_0 : i32, i32
  }
  func.func @transform_7(%arg0: i32) -> (i32, i32) {
    %c0_i32 = arith.constant 0 : i32
    %c0_i32_0 = arith.constant 0 : i32
    %c0_i32_1 = arith.constant 0 : i32
    return %c0_i32, %c0_i32_0 : i32, i32
  }
  func.func @transform_8(%arg0: i32) -> (i32, i32) {
    %c0_i32 = arith.constant 0 : i32
    %c0_i32_0 = arith.constant 0 : i32
    %c0_i32_1 = arith.constant 0 : i32
    return %c0_i32, %c0_i32_0 : i32, i32
  }
  func.func @transform_9(%arg0: i32) -> (i32, i32) {
    %c0_i32 = arith.constant 0 : i32
    %c0_i32_0 = arith.constant 0 : i32
    %c0_i32_1 = arith.constant 0 : i32
    return %c0_i32, %c0_i32_0 : i32, i32
  }
  func.func @transform_10(%arg0: i32) -> (i32, i32) {
    %c0_i32 = arith.constant 0 : i32
    %c0_i32_0 = arith.constant 0 : i32
    return %arg0, %c0_i32 : i32, i32
  }
  func.func @transform_11(%arg0: i32) -> (i32, i32) {
    %c0_i32 = arith.constant 0 : i32
    %c0_i32_0 = arith.constant 0 : i32
    return %arg0, %c0_i32 : i32, i32
  }
}

</mosaic_0001>

<bundles_post_ra>
// kernel: rcritic_forward.1
= control target key start
LH: loop header
LB: loop body
LE: loop exit
PB: predicated region body
PF: predicated region fallthrough
CT: control target
= control target key end

     0   :  { %18 = vsyncpa [#allocation4], 0  ;;  %s959_s0 = inlined_call_operand.vmem [shape: f32[8,12], index: 0, kind: input, shape index: {}]   ;;  %s960_s1 = inlined_call_operand.vmem [shape: f32[8,12], index: 1, kind: input, shape index: {}]   ;;  %s961_s2 = inlined_call_operand.vmem [shape: f32[8,4], index: 2, kind: input, shape index: {}]   ;;  %s962_s3 = inlined_call_operand.vmem [shape: f32[8,4], index: 3, kind: input, shape index: {}]   ;;  %s963_s4 = inlined_call_operand.hbm [shape: f32[8,64], index: 4, kind: input, shape index: {}]   ;;  %s964_s5 = inlined_call_operand.vmem [shape: f32[32,64], index: 5, kind: input, shape index: {}]   ;;  %s965_s6 = inlined_call_operand.vmem [shape: f32[3,64], index: 6, kind: input, shape index: {}]   ;;  %s966_s7 = inlined_call_operand.hbm [shape: f32[128,128], index: 7, kind: input, shape index: {}]   ;;  %s967_s8 = inlined_call_operand.vmem [shape: f32[1,64], index: 8, kind: input, shape index: {}]   ;;  %s968_s9 = inlined_call_operand.<no memory space> [shape: f32[1,1], index: 9, kind: input, shape index: {}]   ;;  %s969_s10 = inlined_call_operand.hbm [shape: f32[8,64], index: 10, kind: output, shape index: {0}]   ;;  %s970_s11 = inlined_call_operand.vmem [shape: f32[8,1], index: 11, kind: output, shape index: {1}]  }
   0x1   :  { %19 = vsyncpa [#allocation7], 0 }
   0x2   :  { %20 = vsyncpa [#allocation5], 0  ;;  %s769_s17 = smov [#allocation3]   ;;  %s770_s19 = smov [#allocation6]  }
   0x3   :  { %s35_s18 = sshll.u32 %s769_s17, 4  ;;  %s48_s20 = sshll.u32 %s770_s19, 4  ;;  %s36_s18 = int_to_ptr.vmem [resolvable:$true] %s35_s18  ;;  %s839_s20 = int_to_ptr.vmem [resolvable:$true] %s48_s20 }
   0x4   :  { %s697_s23 = scalar_lea.hbm %s963_s4, 128 }
   0x5   :  { %p698_p0 = scmp.ne.s32.totalorder %s963_s4, %s697_s23  ;;  %p701_p1 = scmp.lt.u32.totalorder %s697_s23, %s963_s4 }
   0x7   :  { %p703_p2 = pnand %p701_p1, %p698_p0 }
   0x9   :  { %706 = shalt.err (!%p703_p2)
}
   0xa   :  { %s707_s28 = scalar_lea.vmem %s36_s18, 128  ;;  %p712_p4 = scmp.lt.s32.totalorder %s36_s18, %s36_s18 }
   0xb   :  { %p708_p3 = scmp.ne.s32.totalorder %s36_s18, %s707_s28  ;;  %p713_p5 = scmp.lt.s32.totalorder %s707_s28, %s707_s28 }
   0xd   :  { %p714_p6 = por %p713_p5, %p712_p4 }
   0xf   :  { %p715_p7 = pnand %p714_p6, %p708_p3 }
  0x11   :  { %718 = shalt.err (!%p715_p7)
}
  0x12   :  { %38 = dma.hbm_to_vmem [thread:$0]  %s963_s4, 128, %s36_s18, [#allocation4]  }
  0x13   :  { %s719_s14 = scalar_lea.hbm %s966_s7, 2048 }
  0x14   :  { %p720_p8 = scmp.ne.s32.totalorder %s966_s7, %s719_s14  ;;  %p723_p9 = scmp.lt.u32.totalorder %s719_s14, %s966_s7 }
  0x16   :  { %p725_p10 = pnand %p723_p9, %p720_p8 }
  0x18   :  { %728 = shalt.err (!%p725_p10)
}
  0x19   :  { %s729_s21 = scalar_lea.vmem %s839_s20, 2048  ;;  %p734_p12 = scmp.lt.s32.totalorder %s839_s20, %s839_s20 }
  0x1a   :  { %p730_p11 = scmp.ne.s32.totalorder %s839_s20, %s729_s21  ;;  %p735_p13 = scmp.lt.s32.totalorder %s729_s21, %s729_s21 }
  0x1c   :  { %p736_p0 = por %p735_p13, %p734_p12 }
  0x1e   :  { %p737_p1 = pnand %p736_p0, %p730_p11 }
  0x20   :  { %740 = shalt.err (!%p737_p1)
}
  0x21   :  { %s771_s4 = smov 128   ;;  %s772_s18 = smov 8  }
  0x22   :  { %54 = dma.hbm_to_vmem [thread:$0]  %s966_s7, 2048, %s839_s20, [#allocation7], %s771_s4, %s771_s4, %s772_s18  }
  0x23   :  { %763 = dma.done.wait [#allocation4], 128  }
  0x24   :  { %764 = vsyncadd [#allocation4], 4294967168 }
  0x25   :  { %765 = dma.done.wait [#allocation7], 2048  }
  0x26   :  { %766 = vsyncadd [#allocation7], 4294965248  ;;  %v773_v0 = vmov 0.0|0.0   ;;  %vm774_vm0 = vmmov 0   ;;  %v775_v1 = vmov 0.0   ;;  %v66_v2 = vld [vmem:[%s964_s5 + $0x8] sm:$0xff] }
  0x27   :  { %651 = vmatprep.subr.bf16.mxu1 %v773_v0  ;;  %659 = vmatprep.subr.bf16.mxu0 %v773_v0  ;;  %v67_v3 = vld [vmem:[%s964_s5 + $0x10] sm:$0xff]  ;;  %vm76_vm1 = vcmask 1043456   ;;  %v77_v4 = vrot.slane %v66_v2, 4  ;;  %vm776_vm2 = vmmov 1   ;;  %v395_v7 = vld [vmem:[#allocation3] sm:$0xff]  ;;  %s777_s28 = smov 64  }
  0x28   :  { %596 = vmatprep.mubr.msk.f32.mxu1 %vm774_vm0, %v775_v1  ;;  %648 = vmatprep.mubr.msk.f32.mxu0 %vm774_vm0, %v775_v1  ;;  %v78_v5 = vrot.slane %v67_v3, 4  ;;  %vm881_vm3 = vmpackc.low %vm76_vm1, %vm776_vm2  ;;  %v65_v8 = vld [vmem:[%s964_s5] sm:$0xff]  ;;  %v402_v10 = vld [vmem:[#allocation6] sm:$0xff]  ;;  %vm81_vm4 = vcmask 97280   ;;  %vm233_vm5 = vcmask 31744   ;;  %vm400_vm6 = vcmask 523264  }
  0x29   :  { %397 = vrot.lane.b32.xlu0 %v395_v7, %s777_s28  ;;  %v403_v11 = vld [vmem:[#allocation6 + $0x8] sm:$0xff]  ;;  %v404_v14 = vld [vmem:[#allocation6 + $0x10] sm:$0xff]  ;;  %v405_v15 = vld [vmem:[#allocation6 + $0x18] sm:$0xff]  ;;  %v656_v16 = vpack.c.bf16 %v66_v2, %v65_v8 }
  0x2a   :  { %v79_v9 = vsel %vm76_vm1, %v77_v4, %v78_v5  ;;  %v660_v13 = vpack.c.bf16 %v403_v11, %v402_v10  ;;  %v73_v17 = vld [vmem:[%s960_s1] sm:$0xff]  ;;  %v663_v18 = vpack.c.bf16 %v405_v15, %v404_v14  ;;  %v406_v19 = vld [vmem:[#allocation6 + $0x20] sm:$0xff]  ;;  %v407_v20 = vld [vmem:[#allocation6 + $0x28] sm:$0xff] }
  0x2b   :  { %v652_v12 = vpack.c.bf16 %v78_v5, %v79_v9  ;;  %v72_v21 = vld [vmem:[%s959_s0] sm:$0xff]  ;;  %v68_v22 = vld [vmem:[%s964_s5 + $0x18] sm:$0xff]  ;;  %v666_v23 = vpack.c.bf16 %v407_v20, %v406_v19  ;;  %v410_v30 = vld [vmem:[#allocation6 + $0x40] sm:$0xff] }
  0x2c   :  { %661 = vmatpush3.bf16.msra.mxu0 %v660_v13  ;;  %v312_v24 = vrot.slane %v68_v22, 4  ;;  %v232_v25 = vld [vmem:[%s961_s2] sm:$0xff]  ;;  %v408_v27 = vld [vmem:[#allocation6 + $0x30] sm:$0xff]  ;;  %v411_v31 = vld [vmem:[#allocation6 + $0x48] sm:$0xff] }
  0x2d   :  { %654 = vmatpush3.bf16.msk.msra.mxu1 %vm881_vm3, %v652_v12  ;;  %662 = vmatprep.subr.bf16.mxu0 %v773_v0  ;;  %v311_v26 = vld [vmem:[%s962_s3] sm:$0xff]  ;;  %v672_v32 = vpack.c.bf16 %v411_v31, %v410_v30  ;;  %v412_v33 = vld [vmem:[#allocation6 + $0x50] sm:$0xff]  ;;  %v414_v36 = vld [vmem:[#allocation6 + $0x60] sm:$0xff] }
  0x2e   :  { %655 = vmatprep.subr.bf16.mxu1 %v773_v0  ;;  %v409_v28 = vld [vmem:[#allocation6 + $0x38] sm:$0xff]  ;;  %v415_v37 = vld [vmem:[#allocation6 + $0x68] sm:$0xff]  ;;  %v416_v39 = vld [vmem:[#allocation6 + $0x70] sm:$0xff] }
  0x2f   :  { %v669_v29 = vpack.c.bf16 %v409_v28, %v408_v27  ;;  %v413_v34 = vld [vmem:[#allocation6 + $0x58] sm:$0xff]  ;;  %v678_v38 = vpack.c.bf16 %v415_v37, %v414_v36 }
  0x30   :  { %597 = vmatmul.mubr.msk.f32.vlgmr.msra.gmra.mrb[0].mxu1 %vm81_vm4, %v73_v17  ;;  %664 = vmatpush3.bf16.msra.mxu0 %v663_v18  ;;  %v675_v35 = vpack.c.bf16 %v413_v34, %v412_v33  ;;  %v417_v40 = vld [vmem:[#allocation6 + $0x78] sm:$0xff] }
  0x31   :  { %658 = vmatpush3.bf16.msk.msra.mxu1 %vm881_vm3, %v656_v16  ;;  %603 = vmatprep.mubr.msk.f32.mxu1 %vm774_vm0, %v775_v1  ;;  %v681_v41 = vpack.c.bf16 %v417_v40, %v416_v39  ;;  %v562_v42 = vld [vmem:[%s965_s6 + $0x2] ss:$0 sm:$0xff]  ;;  %v560_v51 = vld [vmem:[%s965_s6] ss:$0 sm:$0xff] }
  0x32   :  { %606 = vmatprep.subr.mxu1 %v775_v1  ;;  %665 = vmatprep.subr.bf16.mxu0 %v773_v0  ;;  %v564_v8 = vld [vmem:[%s967_s8] ss:$0 sm:$0xff] }
  0x33   :  { %499 = vrot.lane.b32.xlu0 %v562_v42, %s777_s28 }
  0x34   :  { %604 = vmatmul.mubr.msk.f32.vlgmr.msra.gmra.mrb[2].mxu1 %vm81_vm4, %v72_v21  ;;  %667 = vmatpush3.bf16.msra.mxu0 %v666_v23 }
  0x35   :  { %607 = vmatpush3.msk.msra.mxu1 %vm76_vm1, %v68_v22  ;;  %608 = vmatprep.mubr.msk.f32.mxu1 %vm774_vm0, %v775_v1 }
  0x36   :  { %611 = vmatprep.subr.mxu1 %v775_v1  ;;  %668 = vmatprep.subr.bf16.mxu0 %v773_v0 }
  0x38   :  { %609 = vmatmul.mubr.msk.f32.vlgmr.msra.gmra.mrb[4].mxu1 %vm233_vm5, %v232_v25  ;;  %670 = vmatpush3.bf16.msra.mxu0 %v669_v29 }
  0x39   :  { %612 = vmatpush3.msk.msra.mxu1 %vm76_vm1, %v312_v24  ;;  %613 = vmatprep.mubr.msk.f32.mxu1 %vm774_vm0, %v775_v1 }
  0x3a   :  { %671 = vmatprep.subr.bf16.mxu0 %v773_v0 }
  0x3c   :  { %614 = vmatmul.mubr.msk.f32.vlgmr.msra.gmra.mrb[6].mxu1 %vm233_vm5, %v311_v26  ;;  %673 = vmatpush3.bf16.msra.mxu0 %v672_v32 }
  0x3d   :  { %674 = vmatprep.subr.bf16.mxu0 %v773_v0 }
  0x40   :  { %676 = vmatpush3.bf16.msra.mxu0 %v675_v35 }
  0x41   :  { %677 = vmatprep.subr.bf16.mxu0 %v773_v0 }
  0x44   :  { %679 = vmatpush3.bf16.msra.mxu0 %v678_v38 }
  0x45   :  { %680 = vmatprep.subr.bf16.mxu0 %v773_v0  ;;  %v561_v0 = vld [vmem:[%s965_s6 + $0x1] ss:$0 sm:$0xff]  ;;  %s778_s6 = smov [#allocation8]  }
  0x46   :  { %s538_s23 = sshll.u32 %s778_s6, 4  ;;  %s539_s23 = int_to_ptr.vmem [resolvable:$true] %s538_s23 }
  0x47   :  { %s741_s24 = scalar_lea.vmem %s539_s23, 128  ;;  %p746_p3 = scmp.lt.s32.totalorder %s539_s23, %s539_s23 }
  0x48   :  { %682 = vmatpush3.bf16.msra.mxu0 %v681_v41  ;;  %p742_p2 = scmp.ne.s32.totalorder %s539_s23, %s741_s24  ;;  %p747_p4 = scmp.lt.s32.totalorder %s741_s24, %s741_s24 }
  0x4a   :  { %p748_p5 = por %p747_p4, %p746_p3 }
  0x4c   :  { %p749_p6 = pnand %p748_p5, %p742_p2 }
  0x9b   :  { %v398_v56 = vpop.permute.xlu0 %397 }
  0xa5   :  { %v500_v59 = vpop.permute.xlu0 %499 }
 0x103   :  { %v153_v43 = vpop.f32.mrb[0].mxu1 }
 0x104   :  { %v598_v44 = vpop.f32.mrb[1].mxu1 }
 0x107   :  { %v228_v45 = vpop.f32.mrb[2].mxu1 }
 0x108   :  { %v229_v46 = vadd.f32 %v228_v45, %v153_v43  ;;  %v605_v47 = vpop.f32.mrb[3].mxu1 }
 0x10b   :  { %v306_v48 = vpop.f32.mrb[4].mxu1 }
 0x10c   :  { %v310_v49 = vadd.f32 %v306_v48, %v229_v46  ;;  %v610_v50 = vpop.f32.mrb[5].mxu1 }
 0x10f   :  { %v384_v52 = vpop.f32.mrb[6].mxu1 }
 0x110   :  { %v388_v53 = vadd.f32 %v384_v52, %v310_v49  ;;  %v615_v54 = vpop.f32.mrb[7].mxu1 }
 0x112   :  { %v393_v55 = vadd.f32 %v560_v51, %v388_v53 }
 0x114   :  { %v394_v57 = vmax.f32 %v393_v55, 0.0 }
 0x116   :  { %v401_v58 = vsel %vm400_vm6, %v394_v57, %v398_v56 }
 0x117   :  { %649 = vmatmul.mubr.f32.vlgmr.msra.gmra.mrb[0].mxu0 %v401_v58 }
 0x1ea   :  { %v484_v60 = vpop.f32.mrb[0].mxu0 }
 0x1eb   :  { %v502_v61 = vadd.f32 %v500_v59, %v484_v60  ;;  %v650_v62 = vpop.f32.mrb[1].mxu0  ;;  %v492_v1 = vadd.f32 %v561_v0, %v484_v60 }
 0x1ed   :  { %v503_v63 = vmax.f32 %v502_v61, 0.0  ;;  %v493_v2 = vmax.f32 %v492_v1, 0.0 }
 0x1ef   :  { %505 = vrot.lane.b32.xlu1 %v503_v63, %s777_s28 }
 0x261   :  { %v506_v3 = vpop.permute.xlu1 %505 }
 0x262   :  { %v508_v4 = vadd.f32 %v506_v3, %v493_v2 }
 0x264   :  { %v563_v5 = vmul.f32 -1.442695, %v508_v4 }
 0x266   :  { %693 = vpow2.f32 %v563_v5 }
 0x270   :  { %v694_v6 = vpop.eup %693 }
 0x271   :  { %v512_v7 = vadd.f32 1.0, %v694_v6 }
 0x273   :  { %695 = vrcp.f32 %v512_v7 }
 0x27d   :  { %v696_v9 = vpop.eup %695 }
 0x27e   :  { %515 = vst.msk [vmem:[#allocation8] sm:$0xff] %vm400_vm6, %v696_v9  ;;  %v523_v10 = vmul.f32 %v696_v9, %v564_v8 }
 0x280   :  { %v524_v11 = vsel %vm400_vm6, %v523_v10, 0.0 }
 0x281   :  { %525 = vadd.xlane.f32.xlu1 %v524_v11 }
 0x282   :  { %752 = shalt.err (!%p749_p6)
}
 0x283   :  { %s753_s8 = scalar_lea.hbm %s969_s10, 128 }
 0x284   :  { %p754_p7 = scmp.ne.s32.totalorder %s969_s10, %s753_s8  ;;  %p757_p8 = scmp.lt.u32.totalorder %s753_s8, %s969_s10 }
 0x286   :  { %p759_p9 = pnand %p757_p8, %p754_p7 }
 0x288   :  { %762 = shalt.err (!%p759_p9)
}
 0x289   :  { %541 = dma.vmem_to_hbm [thread:$0]  %s539_s23, 128, %s969_s10, [#allocation5]   ;;  %v528_v12 = vstv %s968_s9  ;;  %vm530_vm7 = vcmask 7168  }
 0x30e   :  { %v526_v13 = vpop.xlane.xlu1 %525 }
 0x30f   :  { %v529_v14 = vadd.f32 %v528_v12, %v526_v13 }
 0x311   :  { %531 = vst.msk [vmem:[%s970_s11] sm:$0xff] %vm530_vm7, %v529_v14 }
 0x312   :  { %767 = dma.done.wait [#allocation5], 128  }
 0x313   :  { %768 = vsyncadd [#allocation5], 4294967168 }
 0x314   :  { %549 = vsyncpa [#allocation4], 1 }
 0x315   :  { %550 = vsyncpa [#allocation7], 1 }
 0x316   :  { %551 = vsyncpa [#allocation5], 1 }

</bundles_post_ra>
